<compile_context>
chip_gen: v6e
topology: v6e:2x2x1
jax: 0.10.0
libtpu: 0.0.40
codegen_flags: <defaults>
</compile_context>

<pallas_src>
import math

import jax
import jax.numpy as jnp
from jax.experimental import pallas as pl
from jax.experimental.pallas import tpu as pltpu

IN_DIM = 324
H_DIM = 128
OUT_DIM = 108
OUT_PAD = 128   # lane-dense output slab -> unmasked vst


def _round_up(n, m):
    return (n + m - 1) // m * m


def _mlp_kernel(x_ref, w1_ref, b1_ref, w2_ref, b2_ref, w3_ref, b3_ref, o_ref):
    # One batch tile per grid step; weights/biases stay VMEM-resident.
    x = x_ref[...].astype(jnp.bfloat16)                  # f32 -> bf16 pack in VMEM, hidden under DMA
    h1 = jnp.dot(x, w1_ref[...], preferred_element_type=jnp.float32) + b1_ref[...]
    h1 = jnp.maximum(h1, 0.0).astype(jnp.bfloat16)
    h2 = jnp.dot(h1, w2_ref[...], preferred_element_type=jnp.float32) + b2_ref[...]
    h2 = jnp.maximum(h2, 0.0).astype(jnp.bfloat16)
    out = jnp.dot(h2, w3_ref[...], preferred_element_type=jnp.float32) + b3_ref[...]
    o_ref[...] = out.astype(o_ref.dtype)                 # (TB, 128) bf16


def _choose_tile(B, tb):
    B8 = _round_up(B, 8)
    TB = min(tb, B8)
    # If a single tile would cover a reasonably large batch, split it so the
    # "parallel" grid axis has >= 2 steps to shard across v7x's two TensorCores.
    if TB == B8 and B8 >= 1024:
        TB = _round_up(B8 // 2, 8)
    return TB


def low_level_dqn_forward_padded(x, params, *, tb=2048):
    """x: (B, 324) f32 -> (B_pad, 128) bf16 Q-value slab.

    Columns >= 108 are ~-1e9 (safe for a direct argmax over the slab); rows >= B
    are batch-padding garbage and must be ignored by the caller.
    """
    w1, b1, w2, b2, w3, b3 = params
    B = x.shape[0]

    TB = _choose_tile(B, tb)
    B_pad = _round_up(B, TB)
    if B_pad != B:
        x = jnp.pad(x, ((0, B_pad - B), (0, 0)))
    n_steps = B_pad // TB

    flops = 2 * B_pad * (IN_DIM * H_DIM + H_DIM * H_DIM + H_DIM * OUT_PAD)
    bytes_accessed = (
        B_pad * IN_DIM * 4                           # f32 x read (no wrapper pad/cast pass)
        + (w1.size + w2.size + w3.size) * 2          # bf16 weights, read once
        + (b1.size + b2.size + b3.size) * 4          # f32 biases
        + B_pad * OUT_PAD * 2                        # bf16 output write
    )
    cost = pl.CostEstimate(flops=flops, transcendentals=0, bytes_accessed=bytes_accessed)

    resident = dict(pipeline_mode=pl.Buffered(1))    # fetched once, single-buffered

    return pl.pallas_call(
        _mlp_kernel,
        out_shape=jax.ShapeDtypeStruct((B_pad, OUT_PAD), jnp.bfloat16),
        grid_spec=pltpu.PrefetchScalarGridSpec(
            num_scalar_prefetch=0,
            grid=(n_steps,),
            in_specs=[
                pl.BlockSpec((TB, IN_DIM), lambda i: (i, 0)),               # raw f32 x tile, pipelined
                pl.BlockSpec((IN_DIM, H_DIM), lambda i: (0, 0), **resident),  # w1 resident
                pl.BlockSpec((1, H_DIM), lambda i: (0, 0), **resident),       # b1 resident
                pl.BlockSpec((H_DIM, H_DIM), lambda i: (0, 0), **resident),   # w2 resident
                pl.BlockSpec((1, H_DIM), lambda i: (0, 0), **resident),       # b2 resident
                pl.BlockSpec((H_DIM, OUT_PAD), lambda i: (0, 0), **resident), # w3 resident
                pl.BlockSpec((1, OUT_PAD), lambda i: (0, 0), **resident),     # b3 resident
            ],
            out_specs=pl.BlockSpec((TB, OUT_PAD), lambda i: (i, 0)),
        ),
        compiler_params=pltpu.CompilerParams(
            dimension_semantics=("parallel",),
        ),
        cost_estimate=cost,
    )(x, w1, b1, w2, b2, w3, b3)


def low_level_dqn_forward(x, params, *, tb=2048):
    """x: (B, 324) f32 -> (B, 108) bf16 Q-values (LowLevelDQN.forward, bf16 compute)."""
    # TODO(synk): for single-env inference (B ~ 8) the call is pure latency
    # (weight DMA + fixed pallas_call overhead); amortize by batching many env
    # states per call or by keeping the bf16 weights VMEM-resident across calls
    # (cross-pallas_call residency, P10) instead of shrinking the tile to 8.
    B = x.shape[0]
    out = low_level_dqn_forward_padded(x, params, tb=tb)
    return out[:B, :OUT_DIM]


def init_params(key):
    """PyTorch nn.Linear-style init U(-1/sqrt(fan_in), +1/sqrt(fan_in)).

    Weights stored as (in, out) bf16 (bf16-native MXU); biases f32 (added on the
    f32 accumulator).  Layer 3 is zero-padded 108 -> 128 output lanes, with b3's
    padded lanes set to -1e9 so an argmax over the padded slab never picks them.
    """
    dims = [(IN_DIM, H_DIM), (H_DIM, H_DIM), (H_DIM, OUT_DIM)]
    out_pads = [H_DIM, H_DIM, OUT_PAD]
    keys = jax.random.split(key, 2 * len(dims))
    params = []
    for idx, ((fan_in, fan_out), pout) in enumerate(zip(dims, out_pads)):
        bound = 1.0 / math.sqrt(fan_in)
        w = jax.random.uniform(keys[2 * idx], (fan_in, fan_out), jnp.float32, -bound, bound)
        b = jax.random.uniform(keys[2 * idx + 1], (1, fan_out), jnp.float32, -bound, bound)
        w_p = jnp.zeros((fan_in, pout), jnp.float32).at[:, :fan_out].set(w)
        fill = 0.0 if pout == fan_out else -1e9
        b_p = jnp.full((1, pout), fill, jnp.float32).at[:, :fan_out].set(b)
        params += [w_p.astype(jnp.bfloat16), b_p]
    return tuple(params)


def reference_forward(x, params):
    """Pure-JAX reference with the same bf16 quantization points as the kernel."""
    w1, b1, w2, b2, w3, b3 = params
    f32 = lambda a: a.astype(jnp.float32)
    xb = x.astype(jnp.bfloat16)
    h1 = jnp.maximum(f32(xb) @ f32(w1) + b1, 0.0).astype(jnp.bfloat16)
    h2 = jnp.maximum(f32(h1) @ f32(w2) + b2, 0.0).astype(jnp.bfloat16)
    out = (f32(h2) @ f32(w3) + b3).astype(jnp.bfloat16)
    return out[:, :OUT_DIM]


if __name__ == "__main__":
    key = jax.random.PRNGKey(0)
    k_params, k_x = jax.random.split(key)

    B = 8  # small batch (single-env RL inference scale)
    params = init_params(k_params)
    x = jax.random.normal(k_x, (B, IN_DIM), jnp.float32)

    out = low_level_dqn_forward(x, params)
    out = jax.block_until_ready(out)

    ref = reference_forward(x, params)
    assert out.shape == (B, OUT_DIM), out.shape

    out32 = out.astype(jnp.float32)
    ref32 = ref.astype(jnp.float32)
    err = float(jnp.max(jnp.abs(out32 - ref32)))
    assert jnp.allclose(out32, ref32, atol=2e-2, rtol=2e-2), err

    print("KERNEL_OK")
</pallas_src>

<mosaic_0001>
module attributes {stable_mosaic.version = 11 : i64} {
  func.func @_mlp_kernel(%arg0: i32, %arg1: memref<8x324xf32, #tpu.memory_space<vmem>>, %arg2: memref<324x128xbf16, #tpu.memory_space<vmem>>, %arg3: memref<1x128xf32, #tpu.memory_space<vmem>>, %arg4: memref<128x128xbf16, #tpu.memory_space<vmem>>, %arg5: memref<1x128xf32, #tpu.memory_space<vmem>>, %arg6: memref<128x128xbf16, #tpu.memory_space<vmem>>, %arg7: memref<1x128xf32, #tpu.memory_space<vmem>>, %arg8: memref<8x128xbf16, #tpu.memory_space<vmem>>) attributes {dimension_semantics = [#tpu.dimension_semantics<parallel>], iteration_bounds = array<i64: 1>, scalar_prefetch = 0 : i64, scratch_operands = 0 : i64, tpu.core_type = #tpu.core_type<tc>, window_params = [{transform_indices = @transform_0, window_bounds = array<i64: 8, 324>}, {pipeline_mode = #tpu.pipeline_mode<synchronous>, transform_indices = @transform_1, window_bounds = array<i64: 324, 128>}, {pipeline_mode = #tpu.pipeline_mode<synchronous>, transform_indices = @transform_2, window_bounds = array<i64: 1, 128>}, {pipeline_mode = #tpu.pipeline_mode<synchronous>, transform_indices = @transform_3, window_bounds = array<i64: 128, 128>}, {pipeline_mode = #tpu.pipeline_mode<synchronous>, transform_indices = @transform_4, window_bounds = array<i64: 1, 128>}, {pipeline_mode = #tpu.pipeline_mode<synchronous>, transform_indices = @transform_5, window_bounds = array<i64: 128, 128>}, {pipeline_mode = #tpu.pipeline_mode<synchronous>, transform_indices = @transform_6, window_bounds = array<i64: 1, 128>}, {transform_indices = @transform_7, window_bounds = array<i64: 8, 128>}]} {
    %c0 = arith.constant 0 : index
    %c0_0 = arith.constant 0 : index
    %0 = vector.load %arg1[%c0, %c0_0] : memref<8x324xf32, #tpu.memory_space<vmem>>, vector<8x324xf32>
    %1 = arith.truncf %0 : vector<8x324xf32> to vector<8x324xbf16>
    %c0_1 = arith.constant 0 : index
    %c0_2 = arith.constant 0 : index
    %2 = vector.load %arg2[%c0_1, %c0_2] : memref<324x128xbf16, #tpu.memory_space<vmem>>, vector<324x128xbf16>
    %cst = arith.constant dense<0.000000e+00> : vector<8x128xf32>
    %3 = tpu.matmul %1, %2, %cst {dimension_numbers = #tpu.dot_dimension_numbers<[1], [0], [0], [1], [0, 0, 1, 1], [], []>} : vector<8x324xbf16>, vector<324x128xbf16>, vector<8x128xf32> -> vector<8x128xf32>
    %c0_3 = arith.constant 0 : index
    %c0_4 = arith.constant 0 : index
    %4 = vector.load %arg3[%c0_3, %c0_4] : memref<1x128xf32, #tpu.memory_space<vmem>>, vector<1x128xf32>
    %5 = vector.broadcast %4 : vector<1x128xf32> to vector<8x128xf32>
    %6 = arith.addf %3, %5 : vector<8x128xf32>
    %cst_5 = arith.constant 0.000000e+00 : f32
    %7 = vector.broadcast %cst_5 : f32 to vector<8x128xf32>
    %8 = arith.maximumf %6, %7 : vector<8x128xf32>
    %9 = arith.truncf %8 : vector<8x128xf32> to vector<8x128xbf16>
    %c0_6 = arith.constant 0 : index
    %c0_7 = arith.constant 0 : index
    %10 = vector.load %arg4[%c0_6, %c0_7] : memref<128x128xbf16, #tpu.memory_space<vmem>>, vector<128x128xbf16>
    %cst_8 = arith.constant dense<0.000000e+00> : vector<8x128xf32>
    %11 = tpu.matmul %9, %10, %cst_8 {dimension_numbers = #tpu.dot_dimension_numbers<[1], [0], [0], [1], [0, 0, 1, 1], [], []>} : vector<8x128xbf16>, vector<128x128xbf16>, vector<8x128xf32> -> vector<8x128xf32>
    %c0_9 = arith.constant 0 : index
    %c0_10 = arith.constant 0 : index
    %12 = vector.load %arg5[%c0_9, %c0_10] : memref<1x128xf32, #tpu.memory_space<vmem>>, vector<1x128xf32>
    %13 = vector.broadcast %12 : vector<1x128xf32> to vector<8x128xf32>
    %14 = arith.addf %11, %13 : vector<8x128xf32>
    %cst_11 = arith.constant 0.000000e+00 : f32
    %15 = vector.broadcast %cst_11 : f32 to vector<8x128xf32>
    %16 = arith.maximumf %14, %15 : vector<8x128xf32>
    %17 = arith.truncf %16 : vector<8x128xf32> to vector<8x128xbf16>
    %c0_12 = arith.constant 0 : index
    %c0_13 = arith.constant 0 : index
    %18 = vector.load %arg6[%c0_12, %c0_13] : memref<128x128xbf16, #tpu.memory_space<vmem>>, vector<128x128xbf16>
    %cst_14 = arith.constant dense<0.000000e+00> : vector<8x128xf32>
    %19 = tpu.matmul %17, %18, %cst_14 {dimension_numbers = #tpu.dot_dimension_numbers<[1], [0], [0], [1], [0, 0, 1, 1], [], []>} : vector<8x128xbf16>, vector<128x128xbf16>, vector<8x128xf32> -> vector<8x128xf32>
    %c0_15 = arith.constant 0 : index
    %c0_16 = arith.constant 0 : index
    %20 = vector.load %arg7[%c0_15, %c0_16] : memref<1x128xf32, #tpu.memory_space<vmem>>, vector<1x128xf32>
    %21 = vector.broadcast %20 : vector<1x128xf32> to vector<8x128xf32>
    %22 = arith.addf %19, %21 : vector<8x128xf32>
    %23 = arith.truncf %22 : vector<8x128xf32> to vector<8x128xbf16>
    %c0_17 = arith.constant 0 : index
    %c0_18 = arith.constant 0 : index
    %24 = vector.load %arg8[%c0_17, %c0_18] : memref<8x128xbf16, #tpu.memory_space<vmem>>, vector<8x128xbf16>
    tpu.vector_store %arg8[%c0_17, %c0_18], %23 {strides = array<i32>} : memref<8x128xbf16, #tpu.memory_space<vmem>>, vector<8x128xbf16>,
    return
  }
  func.func @transform_0(%arg0: i32) -> (i32, i32) {
    %c0_i32 = arith.constant 0 : i32
    %c0_i32_0 = arith.constant 0 : i32
    return %arg0, %c0_i32 : i32, i32
  }
  func.func @transform_1(%arg0: i32) -> (i32, i32) {
    %c0_i32 = arith.constant 0 : i32
    %c0_i32_0 = arith.constant 0 : i32
    %c0_i32_1 = arith.constant 0 : i32
    return %c0_i32, %c0_i32_0 : i32, i32
  }
  func.func @transform_2(%arg0: i32) -> (i32, i32) {
    %c0_i32 = arith.constant 0 : i32
    %c0_i32_0 = arith.constant 0 : i32
    %c0_i32_1 = arith.constant 0 : i32
    return %c0_i32, %c0_i32_0 : i32, i32
  }
  func.func @transform_3(%arg0: i32) -> (i32, i32) {
    %c0_i32 = arith.constant 0 : i32
    %c0_i32_0 = arith.constant 0 : i32
    %c0_i32_1 = arith.constant 0 : i32
    return %c0_i32, %c0_i32_0 : i32, i32
  }
  func.func @transform_4(%arg0: i32) -> (i32, i32) {
    %c0_i32 = arith.constant 0 : i32
    %c0_i32_0 = arith.constant 0 : i32
    %c0_i32_1 = arith.constant 0 : i32
    return %c0_i32, %c0_i32_0 : i32, i32
  }
  func.func @transform_5(%arg0: i32) -> (i32, i32) {
    %c0_i32 = arith.constant 0 : i32
    %c0_i32_0 = arith.constant 0 : i32
    %c0_i32_1 = arith.constant 0 : i32
    return %c0_i32, %c0_i32_0 : i32, i32
  }
  func.func @transform_6(%arg0: i32) -> (i32, i32) {
    %c0_i32 = arith.constant 0 : i32
    %c0_i32_0 = arith.constant 0 : i32
    %c0_i32_1 = arith.constant 0 : i32
    return %c0_i32, %c0_i32_0 : i32, i32
  }
  func.func @transform_7(%arg0: i32) -> (i32, i32) {
    %c0_i32 = arith.constant 0 : i32
    %c0_i32_0 = arith.constant 0 : i32
    return %arg0, %c0_i32 : i32, i32
  }
}

</mosaic_0001>

<bundles_post_ra>
// kernel: tpu_custom_call.1
= control target key start
LH: loop header
LB: loop body
LE: loop exit
PB: predicated region body
PF: predicated region fallthrough
CT: control target
= control target key end

     0   :  { %12 = vsyncpa [#allocation3], 0  ;;  %s995_s0 = inlined_call_operand.hbm [shape: f32[8,324], index: 0, kind: input, shape index: {}]   ;;  %s996_s1 = inlined_call_operand.hbm [shape: bf16[324,128], index: 1, kind: input, shape index: {}]   ;;  %s997_s2 = inlined_call_operand.vmem [shape: f32[1,128], index: 2, kind: input, shape index: {}]   ;;  %s998_s3 = inlined_call_operand.hbm [shape: bf16[128,128], index: 3, kind: input, shape index: {}]   ;;  %s999_s4 = inlined_call_operand.vmem [shape: f32[1,128], index: 4, kind: input, shape index: {}]   ;;  %s1000_s5 = inlined_call_operand.hbm [shape: bf16[128,128], index: 5, kind: input, shape index: {}]   ;;  %s1001_s6 = inlined_call_operand.vmem [shape: f32[1,128], index: 6, kind: input, shape index: {}]   ;;  %s1002_s7 = inlined_call_operand.hbm [shape: bf16[8,128], index: 7, kind: output, shape index: {}]  }
   0x1   :  { %13 = vsyncpa [#allocation6], 0 }
   0x2   :  { %14 = vsyncpa [#allocation9], 0 }
   0x3   :  { %15 = vsyncpa [#allocation4], 0  ;;  %s886_s24 = smov [#allocation5]  }
   0x4   :  { %s31_s25 = sshll.u32 %s886_s24, 4  ;;  %s32_s25 = int_to_ptr.vmem [resolvable:$true] %s31_s25 }
   0x5   :  { %s786_s26 = scalar_lea.vmem %s32_s25, 2624  ;;  %p791_p1 = scmp.lt.s32.totalorder %s32_s25, %s32_s25 }
   0x6   :  { %p787_p0 = scmp.ne.s32.totalorder %s32_s25, %s786_s26  ;;  %p792_p2 = scmp.lt.s32.totalorder %s786_s26, %s786_s26 }
   0x8   :  { %p793_p3 = por %p792_p2, %p791_p1 }
   0xa   :  { %p794_p4 = pnand %p793_p3, %p787_p0 }
   0xc   :  { %797 = shalt.err (!%p794_p4)
}
   0xd   :  { %s887_s27 = smov 64   ;;  %s888_s28 = smov 4  }
   0xe   :  { %37 = dma.hbm_to_vmem [thread:$0]  %s996_s1, 2624, %s32_s25, [#allocation6], %s887_s27, %s887_s27, %s888_s28  }
   0xf   :  { %s889_s8 = smov [#allocation2]   ;;  %s890_s10 = smov [#allocation7]  }
  0x10   :  { %s22_s9 = sshll.u32 %s889_s8, 4  ;;  %s45_s11 = sshll.u32 %s890_s10, 4  ;;  %s23_s9 = int_to_ptr.vmem [resolvable:$true] %s22_s9  ;;  %s46_s11 = int_to_ptr.vmem [resolvable:$true] %s45_s11 }
  0x11   :  { %s806_s12 = scalar_lea.vmem %s23_s9, 384  ;;  %p811_p6 = scmp.lt.s32.totalorder %s23_s9, %s23_s9 }
  0x12   :  { %p807_p5 = scmp.ne.s32.totalorder %s23_s9, %s806_s12  ;;  %p812_p7 = scmp.lt.s32.totalorder %s806_s12, %s806_s12 }
  0x14   :  { %p813_p8 = por %p812_p7, %p811_p6 }
  0x16   :  { %p814_p9 = pnand %p813_p8, %p807_p5 }
  0x18   :  { %817 = shalt.err (!%p814_p9)
}
  0x19   :  { %25 = dma.hbm_to_vmem [thread:$0]  %s995_s0, 384, %s23_s9, [#allocation3]  }
  0x1a   :  { %s826_s15 = scalar_lea.vmem %s46_s11, 1024  ;;  %p831_p11 = scmp.lt.s32.totalorder %s46_s11, %s46_s11 }
  0x1b   :  { %p827_p10 = scmp.ne.s32.totalorder %s46_s11, %s826_s15  ;;  %p832_p12 = scmp.lt.s32.totalorder %s826_s15, %s826_s15 }
  0x1d   :  { %p833_p13 = por %p832_p12, %p831_p11 }
  0x1f   :  { %p834_p0 = pnand %p833_p13, %p827_p10 }
  0x21   :  { %837 = shalt.err (!%p834_p0)
}
  0x22   :  { %51 = dma.hbm_to_vmem [thread:$0]  %s998_s3, 1024, %s46_s11, [#allocation6], %s887_s27, %s887_s27, %s888_s28  }
  0x23   :  { %s891_s17 = smov [#allocation8]  }
  0x24   :  { %s59_s18 = sshll.u32 %s891_s17, 4  ;;  %s60_s18 = int_to_ptr.vmem [resolvable:$true] %s59_s18 }
  0x25   :  { %s846_s19 = scalar_lea.vmem %s60_s18, 1024  ;;  %p851_p2 = scmp.lt.s32.totalorder %s60_s18, %s60_s18 }
  0x26   :  { %p847_p1 = scmp.ne.s32.totalorder %s60_s18, %s846_s19  ;;  %p852_p3 = scmp.lt.s32.totalorder %s846_s19, %s846_s19 }
  0x28   :  { %p853_p4 = por %p852_p3, %p851_p2 }
  0x2a   :  { %p854_p5 = pnand %p853_p4, %p847_p1 }
  0x2c   :  { %857 = shalt.err (!%p854_p5)
}
  0x2d   :  { %65 = dma.hbm_to_vmem [thread:$0]  %s1000_s5, 1024, %s60_s18, [#allocation9], %s887_s27, %s887_s27, %s888_s28  }
  0x2e   :  { %878 = dma.done.wait [#allocation3], 384  }
  0x2f   :  { %879 = vsyncadd [#allocation3], 4294966912 }
  0x30   :  { %880 = dma.done.wait [#allocation6], 3648  }
  0x31   :  { %881 = vsyncadd [#allocation6], 4294963648 }
  0x32   :  { %882 = dma.done.wait [#allocation9], 1024  }
  0x33   :  { %883 = vsyncadd [#allocation9], 4294966272  ;;  %v892_v0 = vmov 0.0   ;;  %vm893_vm0 = vmmov 0   ;;  %v741_v1 = vld [vmem:[#allocation5 + $0x78] sm:$0xff]   ;;  %v743_v3 = vld [vmem:[#allocation5 + $0x70] sm:$0xff]  }
  0x34   :  { %678 = vmatprep.subr.bf16.mxu1 %v892_v0  ;;  %688 = vmatprep.mubr.msk.bf16.mxu1 %vm893_vm0, %v892_v0  ;;  %v742_v2 = vld [vmem:[#allocation5 + $0x38] sm:$0xff]   ;;  %v744_v4 = vld [vmem:[#allocation5 + $0x30] sm:$0xff]   ;;  %v745_v5 = vld [vmem:[#allocation5 + $0x68] sm:$0xff]   ;;  %vm262_vm1 = vcmask 1041408   ;;  %vm258_vm2 = vcmask 556032   ;;  %s894_s24 = smov [#allocation10]  }
  0x35   :  { %632 = vmatprep.subr.bf16.mxu0 %v741_v1  ;;  %v746_v6 = vld [vmem:[#allocation5 + $0x28] sm:$0xff]   ;;  %v747_v7 = vld [vmem:[#allocation5 + $0x60] sm:$0xff]   ;;  %v752_v11 = vld [vmem:[#allocation5 + $0x98] sm:$0xff]   ;;  %s580_s25 = sshll.u32 %s894_s24, 4  ;;  %s581_s25 = int_to_ptr.vmem [resolvable:$true] %s580_s25 }
  0x36   :  { %633 = vmatpush3.bf16.msra.mxu0 %v742_v2  ;;  %v749_v8 = vld [vmem:[#allocation5 + $0xa0] ss:$0 sps:$4 sm:$0x33]   ;;  %v750_v12 = vld [vmem:[#allocation5 + $0x58] sm:$0xff]   ;;  %v755_v14 = vld [vmem:[#allocation5 + $0x90] sm:$0xff]   ;;  %p863_p7 = scmp.lt.s32.totalorder %s581_s25, %s581_s25 }
  0x37   :  { %634 = vmatprep.subr.bf16.mxu0 %v743_v3  ;;  %v748_v9 = vld [vmem:[#allocation5 + $0x20] sm:$0xff]   ;;  %v264_v10 = vsel %vm262_vm1, %v749_v8, 0  ;;  %v751_v13 = vld [vmem:[#allocation5 + $0x18] sm:$0xff]   ;;  %v753_v15 = vld [vmem:[#allocation5 + $0x50] sm:$0xff]  }
  0x38   :  { %679 = vmatpush3.bf16.msra.mxu1 %v264_v10  ;;  %v754_v16 = vld [vmem:[#allocation5 + $0x10] sm:$0xff]   ;;  %v758_v17 = vld [vmem:[#allocation5 + $0x88] sm:$0xff]   ;;  %v761_v22 = vld [vmem:[#allocation5 + $0x80] sm:$0xff]  }
  0x39   :  { %680 = vmatprep.subr.bf16.mxu1 %v892_v0  ;;  %v756_v18 = vld [vmem:[#allocation5 + $0x48] sm:$0xff]   ;;  %v82_v19 = vld [vmem:[#allocation2 + $0x8] sm:$0xff]  ;;  %v83_v23 = vld [vmem:[#allocation2 + $0x10] sm:$0xff] }
  0x3a   :  { %635 = vmatpush3.bf16.msra.mxu0 %v744_v4  ;;  %v757_v20 = vld [vmem:[#allocation5 + $0x8] sm:$0xff]   ;;  %v85_v21 = vpack.c.bf16 %v82_v19, %v82_v19  ;;  %v759_v24 = vld [vmem:[#allocation5 + $0x40] sm:$0xff]   ;;  %v86_v27 = vpack.c.bf16 %v83_v23, %v83_v23  ;;  %v763_v29 = vld [vmem:[#allocation7 + $0x30] sm:$0xff]  }
  0x3b   :  { %636 = vmatprep.subr.bf16.mxu0 %v745_v5  ;;  %v760_v25 = vld [vmem:[#allocation5] sm:$0xff]   ;;  %v81_v26 = vld [vmem:[#allocation2] sm:$0xff]  ;;  %v767_v34 = vld [vmem:[#allocation7 + $0x10] sm:$0xff]  }
  0x3c   :  { %681 = vmatpush3.bf16.msra.mxu1 %v752_v11  ;;  %298 = vmatprep.mubr.bf16.mxu0 %v85_v21  ;;  %v762_v28 = vld [vmem:[#allocation7 + $0x38] sm:$0xff]   ;;  %v84_v30 = vpack.c.bf16 %v81_v26, %v81_v26  ;;  %v764_v31 = vld [vmem:[#allocation7 + $0x28] sm:$0xff]   ;;  %v765_v32 = vld [vmem:[#allocation7 + $0x20] sm:$0xff]  }
  0x3d   :  { %682 = vmatprep.subr.bf16.mxu1 %v892_v0  ;;  %v766_v33 = vld [vmem:[#allocation7 + $0x18] sm:$0xff]   ;;  %v768_v35 = vld [vmem:[#allocation7 + $0x8] sm:$0xff]   ;;  %v769_v36 = vld [vmem:[#allocation7] sm:$0xff]  }
  0x3e   :  { %637 = vmatpush3.bf16.msra.mxu0 %v746_v6  ;;  %v770_v37 = vld [vmem:[#allocation8 + $0x38] sm:$0xff]   ;;  %v771_v38 = vld [vmem:[#allocation8 + $0x30] sm:$0xff]   ;;  %v772_v39 = vld [vmem:[#allocation8 + $0x28] sm:$0xff]  }
  0x3f   :  { %638 = vmatprep.subr.bf16.mxu0 %v747_v7  ;;  %v773_v40 = vld [vmem:[#allocation8 + $0x20] sm:$0xff]   ;;  %v774_v41 = vld [vmem:[#allocation8 + $0x18] sm:$0xff]   ;;  %v775_v42 = vld [vmem:[#allocation8 + $0x10] sm:$0xff]  }
  0x40   :  { %683 = vmatpush3.bf16.msra.mxu1 %v755_v14  ;;  %v591_v47 = vld [vmem:[%s997_s2] ss:$0 sm:$0xff]  ;;  %v776_v57 = vld [vmem:[#allocation8 + $0x8] sm:$0xff]  }
  0x41   :  { %684 = vmatprep.subr.bf16.mxu1 %v892_v0  ;;  %v777_v58 = vld [vmem:[#allocation8] sm:$0xff]  }
  0x42   :  { %639 = vmatpush3.bf16.msra.mxu0 %v748_v9  ;;  %v614_v59 = vld [vmem:[%s999_s4] ss:$0 sm:$0xff]  ;;  %s858_s4 = scalar_lea.vmem %s581_s25, 64 }
  0x43   :  { %640 = vmatprep.subr.bf16.mxu0 %v750_v12  ;;  %v623_v4 = vld [vmem:[%s1001_s6] ss:$0 sm:$0xff]  ;;  %p859_p6 = scmp.ne.s32.totalorder %s581_s25, %s858_s4  ;;  %p864_p8 = scmp.lt.s32.totalorder %s858_s4, %s858_s4 }
  0x44   :  { %685 = vmatpush3.bf16.msra.mxu1 %v758_v17 }
  0x45   :  { %686 = vmatprep.subr.bf16.mxu1 %v892_v0  ;;  %p865_p9 = por %p864_p8, %p863_p7 }
  0x46   :  { %641 = vmatpush3.bf16.msra.mxu0 %v751_v13 }
  0x47   :  { %642 = vmatprep.subr.bf16.mxu0 %v753_v15  ;;  %p866_p10 = pnand %p865_p9, %p859_p6 }
  0x48   :  { %687 = vmatpush3.bf16.msra.mxu1 %v761_v22 }
  0x49   :  { %692 = vmatprep.subr.bf16.mxu1 %v892_v0 }
  0x4a   :  { %643 = vmatpush3.bf16.msra.mxu0 %v754_v16 }
  0x4b   :  { %644 = vmatprep.subr.bf16.mxu0 %v756_v18  ;;  %689 = vmatmul.mubr.msk.bf16.vlgmr.msra.gmra.mxu1 %vm258_vm2, %v86_v27 }
  0x4c   :  { %693 = vmatpush3.bf16.msra.mxu1 %v762_v28  ;;  %708 = vmatprep.mubr.msk.bf16.mxu1 %vm893_vm0, %v892_v0 }
  0x4d   :  { %694 = vmatprep.subr.bf16.mxu1 %v892_v0 }
  0x4e   :  { %645 = vmatpush3.bf16.msra.mxu0 %v757_v20 }
  0x4f   :  { %646 = vmatprep.subr.bf16.mxu0 %v759_v24 }
  0x50   :  { %695 = vmatpush3.bf16.msra.mxu1 %v763_v29 }
  0x51   :  { %696 = vmatprep.subr.bf16.mxu1 %v892_v0 }
  0x52   :  { %647 = vmatpush3.bf16.msra.mxu0 %v760_v25 }
  0x53   :  { %712 = vmatprep.subr.bf16.mxu0 %v892_v0 }
  0x54   :  { %697 = vmatpush3.bf16.msra.mxu1 %v764_v31 }
  0x55   :  { %299 = vmatmul.mubr.bf16.vlgmr.msra.gmra.mxu0 %v84_v30  ;;  %698 = vmatprep.subr.bf16.mxu1 %v892_v0 }
  0x56   :  { %728 = vmatprep.mubr.msk.bf16.mxu0 %vm893_vm0, %v892_v0  ;;  %713 = vmatpush3.bf16.msra.mxu0 %v770_v37 }
  0x57   :  { %714 = vmatprep.subr.bf16.mxu0 %v892_v0 }
  0x58   :  { %699 = vmatpush3.bf16.msra.mxu1 %v765_v32 }
  0x59   :  { %700 = vmatprep.subr.bf16.mxu1 %v892_v0 }
  0x5a   :  { %715 = vmatpush3.bf16.msra.mxu0 %v771_v38 }
  0x5b   :  { %716 = vmatprep.subr.bf16.mxu0 %v892_v0 }
  0x5c   :  { %701 = vmatpush3.bf16.msra.mxu1 %v766_v33 }
  0x5d   :  { %702 = vmatprep.subr.bf16.mxu1 %v892_v0 }
  0x5e   :  { %717 = vmatpush3.bf16.msra.mxu0 %v772_v39 }
  0x5f   :  { %718 = vmatprep.subr.bf16.mxu0 %v892_v0 }
  0x60   :  { %703 = vmatpush3.bf16.msra.mxu1 %v767_v34 }
  0x61   :  { %704 = vmatprep.subr.bf16.mxu1 %v892_v0 }
  0x62   :  { %719 = vmatpush3.bf16.msra.mxu0 %v773_v40 }
  0x63   :  { %720 = vmatprep.subr.bf16.mxu0 %v892_v0 }
  0x64   :  { %705 = vmatpush3.bf16.msra.mxu1 %v768_v35 }
  0x65   :  { %706 = vmatprep.subr.bf16.mxu1 %v892_v0 }
  0x66   :  { %721 = vmatpush3.bf16.msra.mxu0 %v774_v41 }
  0x67   :  { %722 = vmatprep.subr.bf16.mxu0 %v892_v0 }
  0x68   :  { %707 = vmatpush3.bf16.msra.mxu1 %v769_v36 }
  0x6a   :  { %723 = vmatpush3.bf16.msra.mxu0 %v775_v42 }
  0x6b   :  { %724 = vmatprep.subr.bf16.mxu0 %v892_v0 }
  0x6e   :  { %725 = vmatpush3.bf16.msra.mxu0 %v776_v57 }
  0x6f   :  { %726 = vmatprep.subr.bf16.mxu0 %v892_v0 }
  0x72   :  { %727 = vmatpush3.bf16.msra.mxu0 %v777_v58 }
 0x10b   :  { %v340_v43 = vpop.f32.mrf.mxu1 }
 0x10d   :  { %v690_v44 = vpop.f32.mrf.mxu1 }
 0x10f   :  { %v343_v46 = vpop.f32.mrf.mxu1 }
 0x111   :  { %v691_v49 = vpop.f32.mrf.mxu1 }
 0x115   :  { %v648_v45 = vpop.f32.mrf.mxu0 }
 0x117   :  { %v649_v48 = vpop.f32.mrf.mxu0 }
 0x118   :  { %v650_v50 = vadd.f32 %v649_v48, %v648_v45 }
 0x119   :  { %v651_v51 = vpop.f32.mrf.mxu0 }
 0x11a   :  { %v301_v52 = vadd.f32 %v650_v50, %v591_v47 }
 0x11b   :  { %v652_v53 = vpop.f32.mrf.mxu0 }
 0x11c   :  { %v341_v54 = vadd.f32 %v340_v43, %v301_v52 }
 0x11e   :  { %v346_v55 = vmax.f32 %v341_v54, 0.0 }
 0x120   :  { %v347_v56 = vpack.c.bf16 %v346_v55, %v346_v55 }
 0x122   :  { %709 = vmatmul.mubr.bf16.vlgmr.msra.gmra.mxu1 %v347_v56 }
 0x1e2   :  { %v453_v60 = vpop.f32.mrf.mxu1 }
 0x1e3   :  { %v454_v61 = vadd.f32 %v614_v59, %v453_v60 }
 0x1e4   :  { %v710_v62 = vpop.f32.mrf.mxu1 }
 0x1e5   :  { %v459_v63 = vmax.f32 %v454_v61, 0.0 }
 0x1e6   :  { %v456_v1 = vpop.f32.mrf.mxu1 }
 0x1e7   :  { %v460_v2 = vpack.c.bf16 %v459_v63, %v459_v63 }
 0x1e8   :  { %v711_v3 = vpop.f32.mrf.mxu1 }
 0x1e9   :  { %729 = vmatmul.mubr.bf16.vlgmr.msra.gmra.mxu0 %v460_v2 }
 0x2a9   :  { %v566_v5 = vpop.f32.mrf.mxu0 }
 0x2aa   :  { %v567_v0 = vadd.f32 %v623_v4, %v566_v5 }
 0x2ab   :  { %v730_v6 = vpop.f32.mrf.mxu0 }
 0x2ac   :  { %v572_v7 = vpack.c.bf16 %v567_v0, %v567_v0 }
 0x2ad   :  { %v569_v8 = vpop.f32.mrf.mxu0 }
 0x2ae   :  { %573 = vst [vmem:[#allocation10] sm:$0xf] %v572_v7 }
 0x2af   :  { %v731_v9 = vpop.f32.mrf.mxu0 }
 0x2b0   :  { %869 = shalt.err (!%p866_p10)
}
 0x2b1   :  { %583 = dma.vmem_to_hbm [thread:$0]  %s581_s25, 64, %s1002_s7, [#allocation4]  }
 0x2b2   :  { %884 = dma.done.wait [#allocation4], 64  }
 0x2b3   :  { %885 = vsyncadd [#allocation4], 4294967232 }
 0x2b4   :  { %587 = vsyncpa [#allocation3], 1 }
 0x2b5   :  { %588 = vsyncpa [#allocation6], 1 }
 0x2b6   :  { %589 = vsyncpa [#allocation9], 1 }
 0x2b7   :  { %590 = vsyncpa [#allocation4], 1 }

</bundles_post_ra>
